<compile_context>
chip_gen: v7x
topology: tpu7x:2x2x1
jax: 0.10.0
libtpu: 0.0.40
codegen_flags: <defaults>
</compile_context>

<pallas_src>
import functools

import jax
import jax.numpy as jnp
import numpy as np
from jax.experimental import pallas as pl
from jax.experimental.pallas import tpu as pltpu

# ---------------- config (mirrors the `config` dict of the original script) ---
G_dim = 32          # output feature dim of both branch and trunk nets
exp_G = 0.5         # FNN output is divided by G_dim ** exp_G
ACT_B = "tanh"
ACT_T = "tanh"

LAYERS_BRANCH = [16, 32, 32, G_dim]   # branch MLP widths
LAYERS_TRUNK = [2, 32, 32, G_dim]     # trunk MLP widths


def _act(x, name):
    if name in ("relu", "ReLu"):
        return jnp.maximum(x, 0.0)
    if name in ("tanh", "Tanh"):
        return jnp.tanh(x)
    if name in ("gelu", "GELU"):
        return jax.nn.gelu(x)
    if name in ("leaky_relu", "LeakyReLU"):
        return jnp.where(x > 0, x, 0.01 * x)
    if name in ("sigmoid", "Sigmoid"):
        return jax.nn.sigmoid(x)
    raise ValueError(f"unknown activation {name}")


def _round_up(x, m):
    return (x + m - 1) // m * m


def _pick_tile_nt(Nt):
    """Largest useful Nt tile: multiple of 128, <= 512, >= 2 grid steps when Nt is large."""
    if Nt <= 128:
        return 128
    half = -(-Nt // 2)                       # ceil(Nt/2) -> at least 2 grid steps
    return min(512, _round_up(half, 128))


# ---------------- fused Pallas kernel -----------------------------------------
def _deeponet_kernel(bf_ref, t_in_ref, wt1_ref, wt23_ref, bt23_ref, b0_ref,
                     out_ref, *, act_t):
    """Trunk MLP (transposed layout) + combine matmul for one Nt-tile.

    Layout:
      bf_ref   : (Nb_p, G)         precomputed branch features (scale folded)
      t_in_ref : (Kt_p, TILE_NT)   trunk input, TRANSPOSED; row Kt is all-ones
      wt1_ref  : (G, Kt_p)         trunk layer-1 weight, bt1 folded into col Kt
      wt23_ref : (2, G, G)         [wt2, wt3*scale]
      bt23_ref : (G, 2)            [bt2, bt3*scale] as columns
      b0_ref   : (1, 1) in SMEM    DeepONet scalar bias
      out_ref  : (Nb_p, TILE_NT)   lane-dense output tile
    """
    f32 = jnp.float32
    bt = bt23_ref[...]                                                   # (G, 2)

    xt = t_in_ref[...]                                                   # (Kt_p, TILE_NT)
    # layer 1: bias folded into the matmul via the ones row of xt
    xt = _act(jnp.dot(wt1_ref[...], xt, preferred_element_type=f32), act_t)
    # layer 2
    xt = _act(jnp.dot(wt23_ref[0], xt, preferred_element_type=f32) + bt[:, 0:1], act_t)
    # layer 3 (scale already folded into weights/bias)
    tf = jnp.dot(wt23_ref[1], xt, preferred_element_type=f32) + bt[:, 1:2]
    tf = _act(tf, act_t)      # DeepONet's trailing trunk activation (EUP, fused)

    # combine: lane-dense (Nb_p, TILE_NT) matmul + scalar bias
    out_ref[...] = jnp.dot(bf_ref[...], tf, preferred_element_type=f32) + b0_ref[0, 0]
    # TODO(synk): optional bf16 trunk-hidden path for v6e/v7x (bf16 EUP/VPU); skip on v5e.


# ---------------- one-time parameter preparation -------------------------------
def prepare_deeponet_params(branch_params, trunk_params):
    """Transposes / padding / scale & bias folding, done once at init time."""
    scale = jnp.float32(1.0 / (G_dim ** exp_G))

    (wb1, bb1), (wb2, bb2), (wb3, bb3) = branch_params
    branch_prep = (
        (jnp.asarray(wb1.T, jnp.float32), jnp.asarray(bb1, jnp.float32)),
        (jnp.asarray(wb2.T, jnp.float32), jnp.asarray(bb2, jnp.float32)),
        (jnp.asarray(wb3.T, jnp.float32) * scale, jnp.asarray(bb3, jnp.float32) * scale),
    )

    (wt1, bt1), (wt2, bt2), (wt3, bt3) = trunk_params
    G, Kt = wt1.shape
    Kt_p = _round_up(Kt + 1, 8)            # +1 column for the folded layer-1 bias
    wt1_p = (jnp.zeros((G, Kt_p), jnp.float32)
             .at[:, :Kt].set(wt1)
             .at[:, Kt].set(bt1))
    wt23 = jnp.stack([wt2, wt3 * scale]).astype(jnp.float32)            # (2, G, G)
    bt23 = jnp.stack([bt2, bt3 * scale], axis=1).astype(jnp.float32)    # (G, 2)

    return branch_prep, (wt1_p, wt23, bt23)


# ---------------- forward (jitted) ---------------------------------------------
@jax.jit
def deeponet_forward_pallas(b_in, t_in, params, b0):
    """b_in:(Nb,Kb) f32, t_in:(Nt,Kt) f32, b0:(1,1) f32 -> (Nb,Nt) f32."""
    branch_prep, (wt1_p, wt23, bt23) = params
    Nb, _ = b_in.shape
    Nt, Kt = t_in.shape
    G = wt1_p.shape[0]
    Kt_p = wt1_p.shape[1]

    tile_nt = _pick_tile_nt(Nt)
    Nb_p = _round_up(Nb, 8)
    Nt_p = _round_up(Nt, tile_nt)

    # --- branch features once (tiny XLA dot chain; scale folded into wb3/bb3) ---
    (wb1t, bb1), (wb2t, bb2), (wb3t, bb3) = branch_prep
    xb = _act(b_in @ wb1t + bb1, ACT_B)
    xb = _act(xb @ wb2t + bb2, ACT_B)
    bf = xb @ wb3t + bb3                                                # (Nb, G)
    bf_p = jnp.zeros((Nb_p, G), jnp.float32).at[:Nb].set(bf)

    # --- trunk input: transposed (feat x query), zero-padded, ones row for bias ---
    t_in_T = (jnp.zeros((Kt_p, Nt_p), jnp.float32)
              .at[:Kt, :Nt].set(t_in.T)
              .at[Kt, :].set(1.0))

    def resident(shape):
        nd = len(shape)
        return pl.BlockSpec(shape, lambda i, _nd=nd: (0,) * _nd)

    kernel = functools.partial(_deeponet_kernel, act_t=ACT_T)

    out_full = pl.pallas_call(
        kernel,
        out_shape=jax.ShapeDtypeStruct((Nb_p, Nt_p), jnp.float32),
        grid=(Nt_p // tile_nt,),
        in_specs=[
            resident(bf_p.shape),                                   # branch features
            pl.BlockSpec((Kt_p, tile_nt), lambda i: (0, i)),        # trunk input tile
            resident(wt1_p.shape),                                  # trunk L1 weight (+bias col)
            resident(wt23.shape),                                   # trunk L2/L3 weights
            resident(bt23.shape),                                   # trunk L2/L3 biases
            pl.BlockSpec((1, 1), lambda i: (0, 0),
                         memory_space=pltpu.MemorySpace.SMEM),      # scalar bias b0
        ],
        out_specs=pl.BlockSpec((Nb_p, tile_nt), lambda i: (0, i)),
        compiler_params=pltpu.CompilerParams(
            dimension_semantics=("parallel",)),                     # Nt tiles shard across TCs
    )(bf_p, t_in_T, wt1_p, wt23, bt23, b0)

    if Nb_p == Nb and Nt_p == Nt:
        return out_full
    return out_full[:Nb, :Nt]


# ---------------- parameter construction (deterministic, PyTorch-like shapes) -
def init_fnn_params(key, layers):
    """Weights shaped (out, in), biases shaped (out,), like nn.Linear."""
    params = []
    for i in range(len(layers) - 1):
        fan_in, fan_out = layers[i], layers[i + 1]
        key, kw, kb = jax.random.split(key, 3)
        bound = 1.0 / np.sqrt(fan_in)
        w = jax.random.uniform(kw, (fan_out, fan_in), jnp.float32, -bound, bound)
        b = jax.random.uniform(kb, (fan_out,), jnp.float32, -bound, bound)
        params.append((w, b))
    return params, key


# ---------------- pure-JAX reference (for correctness check only) -------------
def fnn_forward_ref(x, params, act_name):
    n = len(params)
    for i, (w, b) in enumerate(params):
        y = x @ w.T + b
        x = _act(y, act_name) if i < n - 1 else y / (G_dim ** exp_G)
    return x


def deeponet_forward_ref(b_in, t_in, branch_params, trunk_params, b0):
    bf = fnn_forward_ref(b_in, branch_params, ACT_B)
    tf = _act(fnn_forward_ref(t_in, trunk_params, ACT_T), ACT_T)
    return jnp.einsum("ij,kj->ik", bf, tf) + b0[0, 0]


# ---------------- main ---------------------------------------------------------
if __name__ == "__main__":
    key = jax.random.PRNGKey(0)

    branch_params, key = init_fnn_params(key, LAYERS_BRANCH)
    trunk_params, key = init_fnn_params(key, LAYERS_TRUNK)
    b0 = jnp.zeros((1, 1), jnp.float32)        # DeepONet's scalar bias parameter
    params = prepare_deeponet_params(branch_params, trunk_params)

    key, kb, kt = jax.random.split(key, 3)
    Nb, Nt = 8, 12
    b_in = jax.random.normal(kb, (Nb, LAYERS_BRANCH[0]), jnp.float32)
    t_in = jax.random.normal(kt, (Nt, LAYERS_TRUNK[0]), jnp.float32)

    out = jax.block_until_ready(deeponet_forward_pallas(b_in, t_in, params, b0))
    ref = deeponet_forward_ref(b_in, t_in, branch_params, trunk_params, b0)
    np.testing.assert_allclose(np.asarray(out), np.asarray(ref), rtol=1e-5, atol=1e-5)
    assert out.shape == (Nb, Nt)

    # Second check: multi-tile grid path (>= 2 grid steps; exercises the folded
    # layer-1 bias and the parallel Nt axis with padding).
    key, kt2 = jax.random.split(key)
    Nt2 = 300
    t_in2 = jax.random.normal(kt2, (Nt2, LAYERS_TRUNK[0]), jnp.float32)
    out2 = jax.block_until_ready(deeponet_forward_pallas(b_in, t_in2, params, b0))
    ref2 = deeponet_forward_ref(b_in, t_in2, branch_params, trunk_params, b0)
    np.testing.assert_allclose(np.asarray(out2), np.asarray(ref2), rtol=1e-5, atol=1e-5)
    assert out2.shape == (Nb, Nt2)

    print("KERNEL_OK")
</pallas_src>

<mosaic_0001>
module attributes {stable_mosaic.version = 11 : i64} {
  func.func @_deeponet_kernel(%arg0: i32, %arg1: memref<8x32xf32, #tpu.memory_space<vmem>>, %arg2: memref<8x128xf32, #tpu.memory_space<vmem>>, %arg3: memref<32x8xf32, #tpu.memory_space<vmem>>, %arg4: memref<2x32x32xf32, #tpu.memory_space<vmem>>, %arg5: memref<32x2xf32, #tpu.memory_space<vmem>>, %arg6: memref<1x1xf32, #tpu.memory_space<smem>>, %arg7: memref<8x128xf32, #tpu.memory_space<vmem>>) attributes {dimension_semantics = [#tpu.dimension_semantics<parallel>], iteration_bounds = array<i64: 1>, scalar_prefetch = 0 : i64, scratch_operands = 0 : i64, tpu.core_type = #tpu.core_type<tc>, window_params = [{pipeline_mode = #tpu.pipeline_mode<synchronous>, transform_indices = @transform_0, window_bounds = array<i64: 8, 32>}, {transform_indices = @transform_1, window_bounds = array<i64: 8, 128>}, {pipeline_mode = #tpu.pipeline_mode<synchronous>, transform_indices = @transform_2, window_bounds = array<i64: 32, 8>}, {pipeline_mode = #tpu.pipeline_mode<synchronous>, transform_indices = @transform_3, window_bounds = array<i64: 2, 32, 32>}, {pipeline_mode = #tpu.pipeline_mode<synchronous>, transform_indices = @transform_4, window_bounds = array<i64: 32, 2>}, {transform_indices = @transform_5, window_bounds = array<i64: 1, 1>}, {transform_indices = @transform_6, window_bounds = array<i64: 8, 128>}]} {
    %c0 = arith.constant 0 : index
    %c0_0 = arith.constant 0 : index
    %0 = vector.load %arg5[%c0, %c0_0] : memref<32x2xf32, #tpu.memory_space<vmem>>, vector<32x2xf32>
    %c0_1 = arith.constant 0 : index
    %c0_2 = arith.constant 0 : index
    %1 = vector.load %arg2[%c0_1, %c0_2] : memref<8x128xf32, #tpu.memory_space<vmem>>, vector<8x128xf32>
    %c0_3 = arith.constant 0 : index
    %c0_4 = arith.constant 0 : index
    %2 = vector.load %arg3[%c0_3, %c0_4] : memref<32x8xf32, #tpu.memory_space<vmem>>, vector<32x8xf32>
    %cst = arith.constant dense<0.000000e+00> : vector<32x128xf32>
    %3 = tpu.matmul %2, %1, %cst {dimension_numbers = #tpu.dot_dimension_numbers<[1], [0], [0], [1], [0, 0, 1, 1], [], []>} : vector<32x8xf32>, vector<8x128xf32>, vector<32x128xf32> -> vector<32x128xf32>
    %4 = math.tanh %3 : vector<32x128xf32>
    %c0_5 = arith.constant 0 : index
    %c0_6 = arith.constant 0 : index
    %c0_7 = arith.constant 0 : index
    %5 = vector.load %arg4[%c0_5, %c0_6, %c0_7] : memref<2x32x32xf32, #tpu.memory_space<vmem>>, vector<1x32x32xf32>
    %6 = vector.shape_cast %5 : vector<1x32x32xf32> to vector<32x32xf32>
    %cst_8 = arith.constant dense<0.000000e+00> : vector<32x128xf32>
    %7 = tpu.matmul %6, %4, %cst_8 {dimension_numbers = #tpu.dot_dimension_numbers<[1], [0], [0], [1], [0, 0, 1, 1], [], []>} : vector<32x32xf32>, vector<32x128xf32>, vector<32x128xf32> -> vector<32x128xf32>
    %8 = vector.extract_strided_slice %0 {offsets = [0, 0], sizes = [32, 1], strides = [1, 1]} : vector<32x2xf32> to vector<32x1xf32>
    %9 = vector.broadcast %8 : vector<32x1xf32> to vector<32x128xf32>
    %10 = arith.addf %7, %9 : vector<32x128xf32>
    %11 = math.tanh %10 : vector<32x128xf32>
    %c1 = arith.constant 1 : index
    %c0_9 = arith.constant 0 : index
    %c0_10 = arith.constant 0 : index
    %12 = vector.load %arg4[%c1, %c0_9, %c0_10] : memref<2x32x32xf32, #tpu.memory_space<vmem>>, vector<1x32x32xf32>
    %13 = vector.shape_cast %12 : vector<1x32x32xf32> to vector<32x32xf32>
    %cst_11 = arith.constant dense<0.000000e+00> : vector<32x128xf32>
    %14 = tpu.matmul %13, %11, %cst_11 {dimension_numbers = #tpu.dot_dimension_numbers<[1], [0], [0], [1], [0, 0, 1, 1], [], []>} : vector<32x32xf32>, vector<32x128xf32>, vector<32x128xf32> -> vector<32x128xf32>
    %15 = vector.extract_strided_slice %0 {offsets = [0, 1], sizes = [32, 1], strides = [1, 1]} : vector<32x2xf32> to vector<32x1xf32>
    %16 = vector.broadcast %15 : vector<32x1xf32> to vector<32x128xf32>
    %17 = arith.addf %14, %16 : vector<32x128xf32>
    %18 = math.tanh %17 : vector<32x128xf32>
    %c0_12 = arith.constant 0 : index
    %c0_13 = arith.constant 0 : index
    %19 = vector.load %arg1[%c0_12, %c0_13] : memref<8x32xf32, #tpu.memory_space<vmem>>, vector<8x32xf32>
    %cst_14 = arith.constant dense<0.000000e+00> : vector<8x128xf32>
    %20 = tpu.matmul %19, %18, %cst_14 {dimension_numbers = #tpu.dot_dimension_numbers<[1], [0], [0], [1], [0, 0, 1, 1], [], []>} : vector<8x32xf32>, vector<32x128xf32>, vector<8x128xf32> -> vector<8x128xf32>
    %c0_15 = arith.constant 0 : index
    %c0_16 = arith.constant 0 : index
    %21 = memref.load %arg6[%c0_15, %c0_16] : memref<1x1xf32, #tpu.memory_space<smem>>
    %22 = vector.broadcast %21 : f32 to vector<8x128xf32>
    %23 = arith.addf %20, %22 : vector<8x128xf32>
    %c0_17 = arith.constant 0 : index
    %c0_18 = arith.constant 0 : index
    %24 = vector.load %arg7[%c0_17, %c0_18] : memref<8x128xf32, #tpu.memory_space<vmem>>, vector<8x128xf32>
    tpu.vector_store %arg7[%c0_17, %c0_18], %23 {strides = array<i32>} : memref<8x128xf32, #tpu.memory_space<vmem>>, vector<8x128xf32>,
    return
  }
  func.func @transform_0(%arg0: i32) -> (i32, i32) {
    %c0_i32 = arith.constant 0 : i32
    %c0_i32_0 = arith.constant 0 : i32
    %c0_i32_1 = arith.constant 0 : i32
    return %c0_i32, %c0_i32_0 : i32, i32
  }
  func.func @transform_1(%arg0: i32) -> (i32, i32) {
    %c0_i32 = arith.constant 0 : i32
    %c0_i32_0 = arith.constant 0 : i32
    return %c0_i32, %arg0 : i32, i32
  }
  func.func @transform_2(%arg0: i32) -> (i32, i32) {
    %c0_i32 = arith.constant 0 : i32
    %c0_i32_0 = arith.constant 0 : i32
    %c0_i32_1 = arith.constant 0 : i32
    return %c0_i32, %c0_i32_0 : i32, i32
  }
  func.func @transform_3(%arg0: i32) -> (i32, i32, i32) {
    %c0_i32 = arith.constant 0 : i32
    %c0_i32_0 = arith.constant 0 : i32
    %c0_i32_1 = arith.constant 0 : i32
    %c0_i32_2 = arith.constant 0 : i32
    return %c0_i32, %c0_i32_0, %c0_i32_1 : i32, i32, i32
  }
  func.func @transform_4(%arg0: i32) -> (i32, i32) {
    %c0_i32 = arith.constant 0 : i32
    %c0_i32_0 = arith.constant 0 : i32
    %c0_i32_1 = arith.constant 0 : i32
    return %c0_i32, %c0_i32_0 : i32, i32
  }
  func.func @transform_5(%arg0: i32) -> (i32, i32) {
    %c0_i32 = arith.constant 0 : i32
    %c0_i32_0 = arith.constant 0 : i32
    %c0_i32_1 = arith.constant 0 : i32
    return %c0_i32, %c0_i32_0 : i32, i32
  }
  func.func @transform_6(%arg0: i32) -> (i32, i32) {
    %c0_i32 = arith.constant 0 : i32
    %c0_i32_0 = arith.constant 0 : i32
    return %c0_i32, %arg0 : i32, i32
  }
}

</mosaic_0001>

<bundles_post_ra>
// kernel: deeponet_forward_pallas.1
= control target key start
LH: loop header
LB: loop body
LE: loop exit
PB: predicated region body
PF: predicated region fallthrough
CT: control target
= control target key end

     0   :  { %vm34_vm0 = vcmask 64512   ;;  %s764_s0 = inlined_call_operand.vmem [shape: f32[8,32], index: 0, kind: input, shape index: {}]   ;;  %s765_s1 = inlined_call_operand.vmem [shape: f32[8,128], index: 1, kind: input, shape index: {}]   ;;  %s766_s2 = inlined_call_operand.vmem [shape: f32[32,8], index: 2, kind: input, shape index: {}]   ;;  %s767_s3 = inlined_call_operand.vmem [shape: f32[2,32,32], index: 3, kind: input, shape index: {}]   ;;  %s768_s4 = inlined_call_operand.vmem [shape: f32[32,2], index: 4, kind: input, shape index: {}]   ;;  %s769_s5 = inlined_call_operand.<no memory space> [shape: f32[1,1], index: 5, kind: input, shape index: {}]   ;;  %s770_s6 = inlined_call_operand.hbm [shape: f32[8,128], index: 6, kind: output, shape index: {}]  }
   0x1   :  { %v29_v0 = vld [vmem:[%s765_s1] sm:$0xff]  ;;  %v31_v2 = vld [vmem:[%s766_s2 + $0x8] sm:$0xff]  ;;  %v32_v3 = vld [vmem:[%s766_s2 + $0x10] sm:$0xff] }
   0x2   :  { %v30_v1 = vld [vmem:[%s766_s2] sm:$0xff]  ;;  %518 = vmatprep.subr.mxu0 %v29_v0 }
   0x3   :  { %520 = vmatprep.mubr.msk.f32.mxu0 %vm34_vm0, %v30_v1 }
   0x4   :  { %12 = vsyncpa [#allocation4], 0  ;;  %519 = vmatpush3.msra.mxu0 %v29_v0  ;;  %v33_v4 = vld [vmem:[%s766_s2 + $0x18] sm:$0xff]  ;;  %v136_v5 = vld [vmem:[%s767_s3] sm:$0xff]  ;;  %vm160_vm1 = vcmask 261120   ;;  %v645_v8 = vmov 0  }
   0x5   :  { %521 = vmatmul.mubr.msk.f32.vlgmr.msra.gmra.mrb[0].mxu0 %vm34_vm0, %v31_v2  ;;  %534 = vmatprep.mubr.msk.f32.mxu1 %vm160_vm1, %v136_v5  ;;  %v25_v6 = vld [vmem:[%s768_s4] sm:$0xff]  ;;  %v27_v7 = vld [vmem:[%s768_s4 + $0x10] sm:$0xff]  ;;  %v26_v9 = vld [vmem:[%s768_s4 + $0x8] sm:$0xff]  ;;  %v646_v25 = vmov 1   ;;  %v647_v47 = vmov 0.0|0.0   ;;  %vm648_vm2 = vmmov 0  }
   0x6   :  { %523 = vmatprep.mubr.msk.f32.mxu0 %vm34_vm0, %v32_v3  ;;  %593 = vset.pattern.permute.xlu0 %v645_v8  ;;  %v28_v10 = vld [vmem:[%s768_s4 + $0x18] sm:$0xff]  ;;  %v137_v21 = vld [vmem:[%s767_s3 + $0x8] sm:$0xff]  ;;  %v138_v22 = vld [vmem:[%s767_s3 + $0x10] sm:$0xff]  ;;  %v649_v48 = vmov 0.0   ;;  %s650_s30 = smov [#allocation3]  }
   0x7   :  { %594 = vset.pattern.permute.xlu1 %v645_v8  ;;  %142 = vperm.xlu0 %593, %v25_v6   ;;  %v139_v23 = vld [vmem:[%s767_s3 + $0x18] sm:$0xff]  ;;  %v483_v24 = vld [vmem:[%s767_s3 + $0x20] sm:$0xff]  ;;  %v484_v44 = vld [vmem:[%s767_s3 + $0x28] sm:$0xff]  ;;  %s467_s7 = sshll.u32 %s650_s30, 4  ;;  %s468_s7 = int_to_ptr.vmem [resolvable:$true] %s467_s7 }
   0x8   :  { %152 = vperm.xlu1 %594, %v27_v7   ;;  %v485_v45 = vld [vmem:[%s767_s3 + $0x30] sm:$0xff]  ;;  %v486_v46 = vld [vmem:[%s767_s3 + $0x38] sm:$0xff]  ;;  %v384_v3 = vld [vmem:[%s764_s0] sm:$0xff]  ;;  %s621_s8 = scalar_lea.vmem %s468_s7, 128  ;;  %p626_p1 = scmp.lt.s32.totalorder %s468_s7, %s468_s7 }
   0x9   :  { %524 = vmatmul.mubr.msk.f32.gmra.mrb[2].mxu0 %vm34_vm0, %v33_v4  ;;  %v386_v4 = vstv %s769_s5  ;;  %p622_p0 = scmp.ne.s32.totalorder %s468_s7, %s621_s8  ;;  %p627_p2 = scmp.lt.s32.totalorder %s621_s8, %s621_s8 }
   0xa   :  { %548 = vmatprep.mubr.msk.f32.mxu0 %vm160_vm1, %v483_v24 }
   0xb   :  { %147 = vperm.xlu0 %593, %v26_v9   ;;  %p628_p3 = por %p627_p2, %p626_p1 }
   0xc   :  { %157 = vperm.xlu1 %594, %v28_v10  }
   0xd   :  { %p629_p4 = pnand %p628_p3, %p622_p0 }
   0xf   :  { %595 = vset.pattern.permute.xlu0 %v646_v25 }
  0x10   :  { %596 = vset.pattern.permute.xlu1 %v646_v25  ;;  %268 = vperm.xlu0 %595, %v25_v6  }
  0x11   :  { %272 = vperm.xlu1 %596, %v26_v9  }
  0x14   :  { %280 = vperm.xlu0 %595, %v28_v10  }
  0x15   :  { %276 = vperm.xlu1 %596, %v27_v7  }
  0x86   :  { %v143_v26 = vpop.permute.xlu0 %142 }
  0x87   :  { %v153_v27 = vpop.permute.xlu1 %152 }
  0x8a   :  { %v148_v28 = vpop.permute.xlu0 %147 }
  0x8b   :  { %v158_v33 = vpop.permute.xlu1 %157 }
  0x8f   :  { %v269_v49 = vpop.permute.xlu0 %268 }
  0x90   :  { %v273_v50 = vpop.permute.xlu1 %272 }
  0x93   :  { %v281_v55 = vpop.permute.xlu0 %280 }
  0x94   :  { %v277_v57 = vpop.permute.xlu1 %276 }
  0xd8   :  { %v522_v11 = vpop.f32.mrb[0].mxu0 }
  0xd9   :  { %597 = vtanh.f32 %v522_v11  ;;  %v113_v12 = vpop.f32.mrb[1].mxu0 }
  0xda   :  { %599 = vtanh.f32 %v113_v12 }
  0xdc   :  { %v525_v13 = vpop.f32.mrb[2].mxu0 }
  0xdd   :  { %601 = vtanh.f32 %v525_v13  ;;  %v123_v14 = vpop.f32.mrb[3].mxu0 }
  0xde   :  { %603 = vtanh.f32 %v123_v14 }
  0xe3   :  { %v598_v15 = vpop.eup %597 }
  0xe4   :  { %v600_v16 = vpop.eup %599 }
  0xe5   :  { %v565_v17 = vpack.c.bf16 %v598_v15, %v600_v16 }
  0xe7   :  { %v602_v18 = vpop.eup %601  ;;  %566 = vmatprep.subr.bf16.mxu1 %v565_v17 }
  0xe8   :  { %v604_v19 = vpop.eup %603  ;;  %568 = vmatpush3.bf16.msra.mxu1 %v565_v17 }
  0xe9   :  { %v569_v20 = vpack.c.bf16 %v602_v18, %v604_v19 }
  0xeb   :  { %570 = vmatprep.subr.bf16.mxu1 %v569_v20 }
  0xec   :  { %572 = vmatpush3.bf16.msra.mxu1 %v569_v20 }
  0xed   :  { %581 = vmatprep.subr.bf16.mxu1 %v647_v47 }
  0xef   :  { %535 = vmatmul.mubr.msk.f32.vlgmr.msra.gmra.mrb[0].mxu1 %vm160_vm1, %v137_v21 }
  0xf0   :  { %537 = vmatprep.mubr.msk.f32.mxu1 %vm160_vm1, %v138_v22 }
  0xf3   :  { %538 = vmatmul.mubr.msk.f32.gmra.mrb[2].mxu1 %vm160_vm1, %v139_v23 }
  0xf4   :  { %562 = vmatprep.mubr.msk.f32.mxu1 %vm648_vm2, %v649_v48 }
 0x1c2   :  { %v536_v29 = vpop.f32.mrb[0].mxu1 }
 0x1c3   :  { %v245_v30 = vadd.f32 %v536_v29, %v148_v28  ;;  %v239_v31 = vpop.f32.mrb[1].mxu1 }
 0x1c4   :  { %v240_v32 = vadd.f32 %v239_v31, %v143_v26 }
 0x1c5   :  { %605 = vtanh.f32 %v245_v30 }
 0x1c6   :  { %607 = vtanh.f32 %v240_v32  ;;  %v539_v34 = vpop.f32.mrb[2].mxu1 }
 0x1c7   :  { %v255_v35 = vadd.f32 %v539_v34, %v158_v33  ;;  %v249_v36 = vpop.f32.mrb[3].mxu1 }
 0x1c8   :  { %v250_v37 = vadd.f32 %v249_v36, %v153_v27 }
 0x1c9   :  { %609 = vtanh.f32 %v255_v35 }
 0x1ca   :  { %611 = vtanh.f32 %v250_v37 }
 0x1cf   :  { %v606_v38 = vpop.eup %605 }
 0x1d0   :  { %v608_v39 = vpop.eup %607 }
 0x1d1   :  { %v573_v40 = vpack.c.bf16 %v606_v38, %v608_v39 }
 0x1d3   :  { %v610_v41 = vpop.eup %609  ;;  %574 = vmatprep.subr.bf16.mxu0 %v573_v40 }
 0x1d4   :  { %v612_v42 = vpop.eup %611  ;;  %576 = vmatpush3.bf16.msra.mxu0 %v573_v40 }
 0x1d5   :  { %v577_v43 = vpack.c.bf16 %v610_v41, %v612_v42 }
 0x1d7   :  { %578 = vmatprep.subr.bf16.mxu0 %v577_v43 }
 0x1d8   :  { %580 = vmatpush3.bf16.msra.mxu0 %v577_v43 }
 0x1db   :  { %549 = vmatmul.mubr.msk.f32.vlgmr.msra.gmra.mrb[4].mxu0 %vm160_vm1, %v484_v44 }
 0x1dc   :  { %551 = vmatprep.mubr.msk.f32.mxu0 %vm160_vm1, %v485_v45 }
 0x1df   :  { %552 = vmatmul.mubr.msk.f32.gmra.mrb[6].mxu0 %vm160_vm1, %v486_v46 }
 0x2ae   :  { %v550_v51 = vpop.f32.mrb[4].mxu0 }
 0x2af   :  { %v367_v52 = vadd.f32 %v550_v51, %v273_v50  ;;  %v361_v53 = vpop.f32.mrb[5].mxu0 }
 0x2b0   :  { %v362_v54 = vadd.f32 %v361_v53, %v269_v49 }
 0x2b1   :  { %613 = vtanh.f32 %v367_v52 }
 0x2b2   :  { %615 = vtanh.f32 %v362_v54  ;;  %v553_v56 = vpop.f32.mrb[6].mxu0 }
 0x2b3   :  { %v377_v58 = vadd.f32 %v553_v56, %v281_v55  ;;  %v371_v59 = vpop.f32.mrb[7].mxu0 }
 0x2b4   :  { %v372_v60 = vadd.f32 %v371_v59, %v277_v57 }
 0x2b5   :  { %617 = vtanh.f32 %v377_v58 }
 0x2b6   :  { %619 = vtanh.f32 %v372_v60 }
 0x2bb   :  { %v614_v61 = vpop.eup %613 }
 0x2bc   :  { %v616_v62 = vpop.eup %615 }
 0x2bd   :  { %v582_v63 = vpack.c.bf16 %v614_v61, %v616_v62 }
 0x2bf   :  { %v618_v0 = vpop.eup %617  ;;  %583 = vmatpush3.bf16.msra.mxu1 %v582_v63 }
 0x2c0   :  { %v620_v1 = vpop.eup %619  ;;  %584 = vmatprep.subr.bf16.mxu1 %v647_v47 }
 0x2c1   :  { %v585_v2 = vpack.c.bf16 %v618_v0, %v620_v1 }
 0x2c3   :  { %586 = vmatpush3.bf16.msra.mxu1 %v585_v2 }
 0x2c6   :  { %563 = vmatmul.mubr.msk.f32.vlgmr.msra.gmra.mrb[4].mxu1 %vm160_vm1, %v384_v3 }
 0x399   :  { %v456_v5 = vpop.f32.mrb[4].mxu1 }
 0x39a   :  { %v457_v6 = vadd.f32 %v456_v5, %v386_v4  ;;  %v564_v7 = vpop.f32.mrb[5].mxu1 }
 0x39c   :  { %460 = vst [vmem:[#allocation3] sm:$0xff] %v457_v6 }
 0x39d   :  { %632 = shalt.err (!%p629_p4)
}
 0x39e   :  { %s633_s10 = scalar_lea.hbm %s770_s6, 128 }
 0x39f   :  { %p634_p5 = scmp.ne.s32.totalorder %s770_s6, %s633_s10  ;;  %p637_p6 = scmp.lt.u32.totalorder %s633_s10, %s770_s6 }
 0x3a1   :  { %p639_p7 = pnand %p637_p6, %p634_p5 }
 0x3a3   :  { %642 = shalt.err (!%p639_p7)
}
 0x3a4   :  { %470 = dma.vmem_to_hbm [thread:$0]  %s468_s7, 128, %s770_s6, [#allocation4]  }
 0x3a5   :  { %643 = dma.done.wait [#allocation4], 128  }
 0x3a6   :  { %644 = vsyncadd [#allocation4], 4294967168 }
 0x3a7   :  { %474 = vsyncpa [#allocation4], 1 }

</bundles_post_ra>
